<compile_context>
chip_gen: v5e
topology: v5e:2x2
jax: 0.10.0
libtpu: 0.0.40
codegen_flags: <defaults>
</compile_context>

<pallas_src>
import jax
import jax.numpy as jnp
from jax.experimental import pallas as pl
from jax.experimental.pallas import tpu as pltpu


def state_forward(state, **data):
    """Pallas equivalent of State.forward(state=state, **data) -> state.

    Pure identity: zero bytes moved (the dominant optimization for a
    pass-through module).
    """
    del data  # State ignores all extra data; it only returns `state`.
    return state


# ----------------------------------------------------------------------------
# Optional materializing path: produce a *distinct* buffer holding the same
# contents via one streaming HBM->HBM DMA (no TensorCore work, no VMEM stage).
# ----------------------------------------------------------------------------
def _state_dma_copy_kernel(x_hbm, o_hbm, sem):
    # Single whole-tensor HBM -> HBM DMA; the TensorCore only issues the
    # descriptor and waits on the semaphore.
    cp = pltpu.make_async_copy(x_hbm, o_hbm, sem)
    cp.start()
    cp.wait()


def state_forward_materialized(state, **data):
    """Same semantics as State.forward, but guarantees a distinct output buffer."""
    del data

    total = 1
    for d in state.shape:
        total *= int(d)
    if total == 0:
        return state  # nothing to copy

    total_bytes = total * jnp.dtype(state.dtype).itemsize

    return pl.pallas_call(
        _state_dma_copy_kernel,
        out_shape=jax.ShapeDtypeStruct(state.shape, state.dtype),
        in_specs=[pl.BlockSpec(memory_space=pl.ANY)],
        out_specs=pl.BlockSpec(memory_space=pl.ANY),
        scratch_shapes=[pltpu.SemaphoreType.DMA],
        cost_estimate=pl.CostEstimate(
            flops=0, transcendentals=0, bytes_accessed=2 * total_bytes
        ),
    )(state)


if __name__ == "__main__":
    # Small deterministic example consistent with a particle-filter state:
    # batch=2, particles=8, state dim=32.  `weight` is extra data that the
    # State output module ignores.
    B, N, D = 2, 8, 32
    key = jax.random.PRNGKey(0)
    k_state, k_weight = jax.random.split(key)

    state = jax.random.normal(k_state, (B, N, D), dtype=jnp.float32)
    weight = jax.nn.log_softmax(
        jax.random.normal(k_weight, (B, N), dtype=jnp.float32), axis=-1
    )

    # Primary path: zero-cost identity (review item #1: move no bytes).
    out = state_forward(state, weight=weight)
    out = jax.block_until_ready(out)
    assert out.shape == state.shape
    assert out.dtype == state.dtype
    assert jnp.array_equal(out, state), "identity path mismatch"

    # Materializing path: run the Pallas HBM->HBM DMA copy once and verify.
    out_copy = state_forward_materialized(state, weight=weight)
    out_copy = jax.block_until_ready(out_copy)
    assert out_copy.shape == state.shape
    assert out_copy.dtype == state.dtype
    assert jnp.array_equal(out_copy, state), "DMA-copy path mismatch"

    print("KERNEL_OK")
</pallas_src>

<mosaic_0001>
module attributes {stable_mosaic.version = 11 : i64} {
  func.func @_state_dma_copy_kernel(%arg0: memref<2x8x32xf32, #tpu.memory_space<any>>, %arg1: memref<2x8x32xf32, #tpu.memory_space<any>>, %arg2: memref<!tpu.dma_semaphore, #tpu.memory_space<semaphore_mem>>) attributes {dimension_semantics = [], scalar_prefetch = 0 : i64, scratch_operands = 1 : i64, tpu.core_type = #tpu.core_type<tc>} {
    tpu.enqueue_dma source(%arg0 : memref<2x8x32xf32, #tpu.memory_space<any>>) target(%arg1 : memref<2x8x32xf32, #tpu.memory_space<any>>) target_semaphore(%arg2 : memref<!tpu.dma_semaphore, #tpu.memory_space<semaphore_mem>>)
    tpu.wait_dma2 semaphore(%arg2 : memref<!tpu.dma_semaphore, #tpu.memory_space<semaphore_mem>>) src(%arg0 : memref<2x8x32xf32, #tpu.memory_space<any>>) dst(%arg1 : memref<2x8x32xf32, #tpu.memory_space<any>>)
    return
  }
}

</mosaic_0001>

<bundles_post_ra>
// kernel: tpu_custom_call.1
= control target key start
LH: loop header
LB: loop body
LE: loop exit
PB: predicated region body
PF: predicated region fallthrough
CT: control target
= control target key end

     0   :  { %s33_s12 = smov [#allocation2]   ;;  %s34_s13 = smov [#allocation3]   ;;  %s52_s0 = inlined_call_operand.hbm [shape: f32[2,8,32], index: 0, kind: input, shape index: {}]   ;;  %s53_s1 = inlined_call_operand.hbm [shape: f32[2,8,32], index: 1, kind: output, shape index: {}]  }
   0x1   :  { %s10_s8 = sshll.u32 %s52_s0, 4  ;;  %s12_s11 = sshll.u32 %s53_s1, 4  ;;  %s11_s8 = int_to_ptr.hbm [resolvable:$true] %s10_s8  ;;  %s13_s11 = int_to_ptr.hbm [resolvable:$true] %s12_s11 }
   0x2   :  { %s35_s14 = smov 0  }
   0x3   :  { %16 = dma.general %s11_s8, 256, %s13_s11, %s33_s12, %s34_s13, [#allocation4], %s35_s14, 0  }
   0x4   :  { %31 = dma.done.wait [#allocation2], 256 }
   0x5   :  { %32 = vsyncadd [#allocation2], 4294967040 }
   0x6   :  { %21 = vsyncmov [#allocation2] }
   0x9   :  { %s22_s15 = vpop.sfrf %21 }
   0xa   :  { %p27_p0 = scmp.ne.s32.totalorder %s22_s15, 0 }
   0xc   :  { %26 = shalt.err (%p27_p0)  }

</bundles_post_ra>
